<compile_context>
chip_gen: v5e
topology: v5e:2x2
jax: 0.10.0
libtpu: 0.0.40
codegen_flags: <defaults>
</compile_context>

<pallas_src>
import jax
import jax.numpy as jnp
from jax.experimental import pallas as pl
from jax.experimental.pallas import tpu as pltpu


def rnn_fused_kernel(ids_ref, emb_ref, whh_t_ref, wfc_t_ref, bfc_ref,
                     out_ref, xproj_scr):
    """Fused gather + serial tanh-RNN recurrence + fc head.

    ids_ref   : (S*B, 1) int32   time-major flattened token ids (row = t*B + b)
    emb_ref   : (V, H)   float32 emb_w @ W_ih^T + (b_ih + b_hh)
    whh_t_ref : (H, H)   float32 W_hh^T
    wfc_t_ref : (H, C)   float32 W_fc^T
    bfc_ref   : (1, C)   float32 fc bias
    out_ref   : (B, C)   float32 fc(h_n)           (output)
    xproj_scr : (S*B, H) float32 VMEM scratch for the gathered projections
    """
    B = out_ref.shape[0]
    SB, V = ids_ref.shape[0], emb_ref.shape[0]
    S = SB // B

    # ---- In-kernel gather as an exact one-hot matmul (MXU, parallel) -------
    ids = ids_ref[...]                                           # (S*B, 1) i32
    col = jax.lax.broadcasted_iota(jnp.int32, (SB, V), 1)        # lane iota
    onehot = (col == ids).astype(jnp.float32)                    # (S*B, V)
    xproj_scr[...] = jnp.dot(onehot, emb_ref[...],
                             preferred_element_type=jnp.float32)  # (S*B, H)

    # ---- Serial recurrence: W_hh^T loaded once, static unroll over time ----
    whh_t = whh_t_ref[...]
    # h_{-1} = 0, so step 0 needs no matmul: h_0 = tanh(x_0).
    h = jnp.tanh(xproj_scr[0:B, :])
    for t in range(1, S):
        x_t = xproj_scr[t * B:(t + 1) * B, :]
        h = jnp.tanh(x_t + jnp.dot(h, whh_t,
                                   preferred_element_type=jnp.float32))

    # ---- fc head fused into the epilogue: out = h_n @ W_fc^T + b_fc --------
    out_ref[...] = (jnp.dot(h, wfc_t_ref[...],
                            preferred_element_type=jnp.float32)
                    + bfc_ref[...])


@jax.jit
def rnn_forward(token_ids, emb_w, w_ih, w_hh, b_ih, b_hh, w_fc, b_fc):
    """token_ids: (B, S) int32.  Returns (B, num_class) float32."""
    B, S = token_ids.shape
    H = w_ih.shape[0]
    C = w_fc.shape[0]

    # Hoisted parallel precompute: fold the per-step input projection AND both
    # biases into the embedding table once (V rows).  Dropout(p=0) == identity.
    emb_proj = (jnp.dot(emb_w, w_ih.T, preferred_element_type=jnp.float32)
                + (b_ih + b_hh))                                  # (V, H)
    whh_t = w_hh.T                                                # (H, H)
    wfc_t = w_fc.T                                                # (H, C)
    bfc_2d = b_fc.reshape(1, C)
    # Time-major flat ids: row t*B + b  ->  token for batch b at step t.
    ids_2d = token_ids.T.reshape(S * B, 1).astype(jnp.int32)

    out = pl.pallas_call(
        rnn_fused_kernel,
        out_shape=jax.ShapeDtypeStruct((B, C), jnp.float32),
        in_specs=[
            pl.BlockSpec(memory_space=pltpu.MemorySpace.VMEM),  # ids (S*B,1)
            pl.BlockSpec(memory_space=pltpu.MemorySpace.VMEM),  # emb_proj (V,H)
            pl.BlockSpec(memory_space=pltpu.MemorySpace.VMEM),  # W_hh^T (H,H)
            pl.BlockSpec(memory_space=pltpu.MemorySpace.VMEM),  # W_fc^T (H,C)
            pl.BlockSpec(memory_space=pltpu.MemorySpace.VMEM),  # b_fc (1,C)
        ],
        out_specs=pl.BlockSpec(memory_space=pltpu.MemorySpace.VMEM),
        scratch_shapes=[pltpu.VMEM((S * B, H), jnp.float32)],
    )(ids_2d, emb_proj, whh_t, wfc_t, bfc_2d)
    return out


if __name__ == "__main__":
    # Small shapes consistent with the module's forward: x is (batch, num_words).
    vocab_size, embed_size, hidden_size, num_class = 50, 32, 32, 5
    B, S = 2, 8

    key = jax.random.PRNGKey(0)
    k_emb, k_wih, k_whh, k_bih, k_bhh, k_wfc, k_bfc, k_x = jax.random.split(key, 8)

    # Embedding: xavier_normal_ init (std = sqrt(2 / (fan_in + fan_out)))
    emb_std = (2.0 / (vocab_size + embed_size)) ** 0.5
    emb_w = emb_std * jax.random.normal(k_emb, (vocab_size, embed_size), jnp.float32)

    # nn.RNN default init: uniform(-1/sqrt(hidden), 1/sqrt(hidden))
    bound = 1.0 / (hidden_size ** 0.5)
    w_ih = jax.random.uniform(k_wih, (hidden_size, embed_size), jnp.float32, -bound, bound)
    w_hh = jax.random.uniform(k_whh, (hidden_size, hidden_size), jnp.float32, -bound, bound)
    b_ih = jax.random.uniform(k_bih, (hidden_size,), jnp.float32, -bound, bound)
    b_hh = jax.random.uniform(k_bhh, (hidden_size,), jnp.float32, -bound, bound)

    # nn.Linear default init
    fc_bound = 1.0 / (hidden_size ** 0.5)
    w_fc = jax.random.uniform(k_wfc, (num_class, hidden_size), jnp.float32, -fc_bound, fc_bound)
    b_fc = jax.random.uniform(k_bfc, (num_class,), jnp.float32, -fc_bound, fc_bound)

    token_ids = jax.random.randint(k_x, (B, S), 0, vocab_size, jnp.int32)

    out = rnn_forward(token_ids, emb_w, w_ih, w_hh, b_ih, b_hh, w_fc, b_fc)
    out = jax.block_until_ready(out)

    # Pure-JAX reference of the original (un-fused) forward pass.
    x_ref = jnp.take(emb_w, token_ids, axis=0)            # (B, S, E)
    h = jnp.zeros((B, hidden_size), jnp.float32)
    for t in range(S):
        h = jnp.tanh(x_ref[:, t] @ w_ih.T + b_ih + h @ w_hh.T + b_hh)
    ref = h @ w_fc.T + b_fc

    assert out.shape == (B, num_class)
    assert jnp.allclose(out, ref, atol=1e-5, rtol=1e-5)

    print("KERNEL_OK")
</pallas_src>

<mosaic_0001>
module attributes {stable_mosaic.version = 11 : i64} {
  func.func @rnn_fused_kernel(%arg0: memref<16x1xi32, #tpu.memory_space<vmem>>, %arg1: memref<50x32xf32, #tpu.memory_space<vmem>>, %arg2: memref<32x32xf32, #tpu.memory_space<vmem>>, %arg3: memref<32x5xf32, #tpu.memory_space<vmem>>, %arg4: memref<1x5xf32, #tpu.memory_space<vmem>>, %arg5: memref<2x5xf32, #tpu.memory_space<vmem>>, %arg6: memref<16x32xf32, #tpu.memory_space<vmem>>) attributes {dimension_semantics = [], scalar_prefetch = 0 : i64, scratch_operands = 1 : i64, tpu.core_type = #tpu.core_type<tc>} {
    %c0 = arith.constant 0 : index
    %c0_0 = arith.constant 0 : index
    %0 = vector.load %arg0[%c0, %c0_0] : memref<16x1xi32, #tpu.memory_space<vmem>>, vector<16x1xi32>
    %1 = tpu.iota {dimensions = array<i32: 1>} : vector<16x50xi32>
    %2 = vector.broadcast %0 : vector<16x1xi32> to vector<16x50xi32>
    %3 = arith.cmpi eq, %1, %2 : vector<16x50xi32>
    %4 = arith.extui %3 : vector<16x50xi1> to vector<16x50xi32>
    %5 = arith.sitofp %4 : vector<16x50xi32> to vector<16x50xf32>
    %c0_1 = arith.constant 0 : index
    %c0_2 = arith.constant 0 : index
    %6 = vector.load %arg1[%c0_1, %c0_2] : memref<50x32xf32, #tpu.memory_space<vmem>>, vector<50x32xf32>
    %cst = arith.constant dense<0.000000e+00> : vector<16x32xf32>
    %7 = tpu.matmul %5, %6, %cst {dimension_numbers = #tpu.dot_dimension_numbers<[1], [0], [0], [1], [0, 0, 1, 1], [], []>} : vector<16x50xf32>, vector<50x32xf32>, vector<16x32xf32> -> vector<16x32xf32>
    %c0_3 = arith.constant 0 : index
    %c0_4 = arith.constant 0 : index
    %8 = vector.load %arg6[%c0_3, %c0_4] : memref<16x32xf32, #tpu.memory_space<vmem>>, vector<16x32xf32>
    tpu.vector_store %arg6[%c0_3, %c0_4], %7 {strides = array<i32>} : memref<16x32xf32, #tpu.memory_space<vmem>>, vector<16x32xf32>,
    %c0_5 = arith.constant 0 : index
    %c0_6 = arith.constant 0 : index
    %9 = vector.load %arg2[%c0_5, %c0_6] : memref<32x32xf32, #tpu.memory_space<vmem>>, vector<32x32xf32>
    %c0_7 = arith.constant 0 : index
    %c0_8 = arith.constant 0 : index
    %10 = vector.load %arg6[%c0_7, %c0_8] : memref<16x32xf32, #tpu.memory_space<vmem>>, vector<2x32xf32>
    %11 = math.tanh %10 : vector<2x32xf32>
    %c2 = arith.constant 2 : index
    %c0_9 = arith.constant 0 : index
    %12 = vector.load %arg6[%c2, %c0_9] : memref<16x32xf32, #tpu.memory_space<vmem>>, vector<2x32xf32>
    %cst_10 = arith.constant dense<0.000000e+00> : vector<2x32xf32>
    %13 = tpu.matmul %11, %9, %cst_10 {dimension_numbers = #tpu.dot_dimension_numbers<[1], [0], [0], [1], [0, 0, 1, 1], [], []>} : vector<2x32xf32>, vector<32x32xf32>, vector<2x32xf32> -> vector<2x32xf32>
    %14 = arith.addf %12, %13 : vector<2x32xf32>
    %15 = math.tanh %14 : vector<2x32xf32>
    %c4 = arith.constant 4 : index
    %c0_11 = arith.constant 0 : index
    %16 = vector.load %arg6[%c4, %c0_11] : memref<16x32xf32, #tpu.memory_space<vmem>>, vector<2x32xf32>
    %cst_12 = arith.constant dense<0.000000e+00> : vector<2x32xf32>
    %17 = tpu.matmul %15, %9, %cst_12 {dimension_numbers = #tpu.dot_dimension_numbers<[1], [0], [0], [1], [0, 0, 1, 1], [], []>} : vector<2x32xf32>, vector<32x32xf32>, vector<2x32xf32> -> vector<2x32xf32>
    %18 = arith.addf %16, %17 : vector<2x32xf32>
    %19 = math.tanh %18 : vector<2x32xf32>
    %c6 = arith.constant 6 : index
    %c0_13 = arith.constant 0 : index
    %20 = vector.load %arg6[%c6, %c0_13] : memref<16x32xf32, #tpu.memory_space<vmem>>, vector<2x32xf32>
    %cst_14 = arith.constant dense<0.000000e+00> : vector<2x32xf32>
    %21 = tpu.matmul %19, %9, %cst_14 {dimension_numbers = #tpu.dot_dimension_numbers<[1], [0], [0], [1], [0, 0, 1, 1], [], []>} : vector<2x32xf32>, vector<32x32xf32>, vector<2x32xf32> -> vector<2x32xf32>
    %22 = arith.addf %20, %21 : vector<2x32xf32>
    %23 = math.tanh %22 : vector<2x32xf32>
    %c8 = arith.constant 8 : index
    %c0_15 = arith.constant 0 : index
    %24 = vector.load %arg6[%c8, %c0_15] : memref<16x32xf32, #tpu.memory_space<vmem>>, vector<2x32xf32>
    %cst_16 = arith.constant dense<0.000000e+00> : vector<2x32xf32>
    %25 = tpu.matmul %23, %9, %cst_16 {dimension_numbers = #tpu.dot_dimension_numbers<[1], [0], [0], [1], [0, 0, 1, 1], [], []>} : vector<2x32xf32>, vector<32x32xf32>, vector<2x32xf32> -> vector<2x32xf32>
    %26 = arith.addf %24, %25 : vector<2x32xf32>
    %27 = math.tanh %26 : vector<2x32xf32>
    %c10 = arith.constant 10 : index
    %c0_17 = arith.constant 0 : index
    %28 = vector.load %arg6[%c10, %c0_17] : memref<16x32xf32, #tpu.memory_space<vmem>>, vector<2x32xf32>
    %cst_18 = arith.constant dense<0.000000e+00> : vector<2x32xf32>
    %29 = tpu.matmul %27, %9, %cst_18 {dimension_numbers = #tpu.dot_dimension_numbers<[1], [0], [0], [1], [0, 0, 1, 1], [], []>} : vector<2x32xf32>, vector<32x32xf32>, vector<2x32xf32> -> vector<2x32xf32>
    %30 = arith.addf %28, %29 : vector<2x32xf32>
    %31 = math.tanh %30 : vector<2x32xf32>
    %c12 = arith.constant 12 : index
    %c0_19 = arith.constant 0 : index
    %32 = vector.load %arg6[%c12, %c0_19] : memref<16x32xf32, #tpu.memory_space<vmem>>, vector<2x32xf32>
    %cst_20 = arith.constant dense<0.000000e+00> : vector<2x32xf32>
    %33 = tpu.matmul %31, %9, %cst_20 {dimension_numbers = #tpu.dot_dimension_numbers<[1], [0], [0], [1], [0, 0, 1, 1], [], []>} : vector<2x32xf32>, vector<32x32xf32>, vector<2x32xf32> -> vector<2x32xf32>
    %34 = arith.addf %32, %33 : vector<2x32xf32>
    %35 = math.tanh %34 : vector<2x32xf32>
    %c14 = arith.constant 14 : index
    %c0_21 = arith.constant 0 : index
    %36 = vector.load %arg6[%c14, %c0_21] : memref<16x32xf32, #tpu.memory_space<vmem>>, vector<2x32xf32>
    %cst_22 = arith.constant dense<0.000000e+00> : vector<2x32xf32>
    %37 = tpu.matmul %35, %9, %cst_22 {dimension_numbers = #tpu.dot_dimension_numbers<[1], [0], [0], [1], [0, 0, 1, 1], [], []>} : vector<2x32xf32>, vector<32x32xf32>, vector<2x32xf32> -> vector<2x32xf32>
    %38 = arith.addf %36, %37 : vector<2x32xf32>
    %39 = math.tanh %38 : vector<2x32xf32>
    %c0_23 = arith.constant 0 : index
    %c0_24 = arith.constant 0 : index
    %40 = vector.load %arg3[%c0_23, %c0_24] : memref<32x5xf32, #tpu.memory_space<vmem>>, vector<32x5xf32>
    %cst_25 = arith.constant dense<0.000000e+00> : vector<2x5xf32>
    %41 = tpu.matmul %39, %40, %cst_25 {dimension_numbers = #tpu.dot_dimension_numbers<[1], [0], [0], [1], [0, 0, 1, 1], [], []>} : vector<2x32xf32>, vector<32x5xf32>, vector<2x5xf32> -> vector<2x5xf32>
    %c0_26 = arith.constant 0 : index
    %c0_27 = arith.constant 0 : index
    %42 = vector.load %arg4[%c0_26, %c0_27] : memref<1x5xf32, #tpu.memory_space<vmem>>, vector<1x5xf32>
    %43 = vector.broadcast %42 : vector<1x5xf32> to vector<2x5xf32>
    %44 = arith.addf %41, %43 : vector<2x5xf32>
    %c0_28 = arith.constant 0 : index
    %c0_29 = arith.constant 0 : index
    %45 = vector.load %arg5[%c0_28, %c0_29] : memref<2x5xf32, #tpu.memory_space<vmem>>, vector<2x5xf32>
    tpu.vector_store %arg5[%c0_28, %c0_29], %44 {strides = array<i32>} : memref<2x5xf32, #tpu.memory_space<vmem>>, vector<2x5xf32>,
    return
  }
}

</mosaic_0001>

<bundles_post_ra>
// kernel: rnn_forward.1
= control target key start
LH: loop header
LB: loop body
LE: loop exit
PB: predicated region body
PF: predicated region fallthrough
CT: control target
= control target key end

     0   :  { %vm51_vm0 = vcmask 1041408   ;;  %v378_v2 = vmov 0   ;;  %s478_s0 = inlined_call_operand.vmem [shape: s32[16,1], index: 0, kind: input, shape index: {}]   ;;  %s479_s1 = inlined_call_operand.vmem [shape: f32[50,32], index: 1, kind: input, shape index: {}]   ;;  %s480_s2 = inlined_call_operand.vmem [shape: f32[32,32], index: 2, kind: input, shape index: {}]   ;;  %s481_s3 = inlined_call_operand.vmem [shape: f32[32,5], index: 3, kind: input, shape index: {}]   ;;  %s482_s4 = inlined_call_operand.vmem [shape: f32[1,5], index: 4, kind: input, shape index: {}]   ;;  %s483_s5 = inlined_call_operand.hbm [shape: f32[2,5], index: 5, kind: output, shape index: {}]  }
   0x1   :  { %v21_v0 = vld [vmem:[%s478_s0] sm:$0xff]  ;;  %v43_v1 = vld [vmem:[%s479_s1 + $0x30] sm:$0x3]  ;;  %334 = vset.pattern.permute.xlu0 %v378_v2  ;;  %v42_v3 = vld [vmem:[%s479_s1 + $0x28] sm:$0xff] }
   0x2   :  { %320 = vmatpush.msk.msra.mxu0 %vm51_vm0, %v43_v1  ;;  %26 = vperm.xlu0 %334, %v21_v0   ;;  %v41_v4 = vld [vmem:[%s479_s1 + $0x20] sm:$0xff] }
   0x4   :  { %65 = vmatpush.msra.mxu0 %v42_v3 }
   0x5   :  { %10 = vsyncpa [#allocation4], 0  ;;  %v40_v5 = vld [vmem:[%s479_s1 + $0x18] sm:$0xff]  ;;  %v39_v6 = vld [vmem:[%s479_s1 + $0x10] sm:$0xff]  ;;  %v23_v10 = vlaneseq  ;;  %vm44_vm1 = vcmask 408576   ;;  %v379_v13 = vmov 0.0  }
   0x6   :  { %66 = vmatpush.msra.mxu0 %v41_v4  ;;  %v22_v7 = vld [vmem:[%s478_s0 + $0x8] sm:$0xff]  ;;  %v37_v9 = vld [vmem:[%s479_s1] sm:$0xff]  ;;  %v84_v17 = vld [vmem:[%s480_s2 + $0x18] sm:$0xff]  ;;  %vm78_vm4 = vcmask 261120   ;;  %s380_s26 = smov [#allocation3]   ;;  %s309_s30 = sshll.u32 %s483_s5, 4  ;;  %s310_s30 = int_to_ptr.hbm [resolvable:$true] %s309_s30 }
   0x7   :  { %v38_v8 = vld [vmem:[%s479_s1 + $0x8] sm:$0xff]  ;;  %v24_v11 = vand.u32 127, %v23_v10  ;;  %103 = vmatpush.msra.mxu1 %v84_v17  ;;  %v83_v18 = vld [vmem:[%s480_s2 + $0x10] sm:$0xff]  ;;  %129 = vmatpush.msra.mxu2 %v84_v17  ;;  %v81_v20 = vld [vmem:[%s480_s2] sm:$0xff]  ;;  %s307_s27 = sshll.u32 %s380_s26, 4  ;;  %vm300_vm5 = vcmask 33792   ;;  %s308_s27 = int_to_ptr.vmem [resolvable:$true] %s307_s27 }
   0x8   :  { %67 = vmatpush.msra.mxu0 %v40_v5  ;;  %v82_v19 = vld [vmem:[%s480_s2 + $0x8] sm:$0xff]  ;;  %155 = vmatpush.msra.mxu3 %v84_v17  ;;  %v272_v49 = vld [vmem:[%s481_s3 + $0x18] sm:$0xff]  ;;  %v271_v50 = vld [vmem:[%s481_s3 + $0x10] sm:$0xff] }
   0x9   :  { %104 = vmatpush.msra.mxu1 %v83_v18  ;;  %130 = vmatpush.msra.mxu2 %v83_v18  ;;  %v270_v51 = vld [vmem:[%s481_s3 + $0x8] sm:$0xff]  ;;  %v269_v52 = vld [vmem:[%s481_s3] sm:$0xff] }
   0xa   :  { %68 = vmatpush.msra.mxu0 %v39_v6  ;;  %29 = vperm.xlu0 %334, %v22_v7   ;;  %v335_v57 = vld [vmem:[%s482_s4] ss:$0 sm:$0xff] }
   0xb   :  { %156 = vmatpush.msra.mxu3 %v83_v18  ;;  %105 = vmatpush.msra.mxu1 %v82_v19 }
   0xc   :  { %69 = vmatpush.msra.mxu0 %v38_v8  ;;  %131 = vmatpush.msra.mxu2 %v82_v19 }
   0xd   :  { %157 = vmatpush.msra.mxu3 %v82_v19  ;;  %106 = vmatpush.msra.mxu1 %v81_v20 }
   0xe   :  { %70 = vmatpush.msra.mxu0 %v37_v9  ;;  %132 = vmatpush.msra.mxu2 %v81_v20 }
   0xf   :  { %158 = vmatpush.msra.mxu3 %v81_v20  ;;  %181 = vmatpush.msrb.mxu1 %v84_v17 }
  0x10   :  { %207 = vmatpush.msrb.mxu2 %v84_v17 }
  0x11   :  { %233 = vmatpush.msrb.mxu3 %v84_v17  ;;  %182 = vmatpush.msrb.mxu1 %v83_v18 }
  0x12   :  { %208 = vmatpush.msrb.mxu2 %v83_v18 }
  0x13   :  { %234 = vmatpush.msrb.mxu3 %v83_v18  ;;  %183 = vmatpush.msrb.mxu1 %v82_v19 }
  0x14   :  { %209 = vmatpush.msrb.mxu2 %v82_v19 }
  0x15   :  { %235 = vmatpush.msrb.mxu3 %v82_v19  ;;  %184 = vmatpush.msrb.mxu1 %v81_v20 }
  0x16   :  { %210 = vmatpush.msrb.mxu2 %v81_v20 }
  0x17   :  { %236 = vmatpush.msrb.mxu3 %v81_v20 }
  0x74   :  { %v27_v12 = vpop.permute.xlu0 %26 }
  0x75   :  { %vm31_vm2 = vcmp.eq.s32.totalorder %v24_v11, %v27_v12 }
  0x76   :  { %v318_v14 = vsel %vm31_vm2, 1.0, %v379_v13 }
  0x77   :  { %321 = vmatmul.msk.f32.vlgmr.msra.gmra.mxu0 %vm44_vm1, %v318_v14 }
  0x7c   :  { %v30_v15 = vpop.permute.xlu0 %29 }
  0x7d   :  { %vm32_vm3 = vcmp.eq.s32.totalorder %v24_v11, %v30_v15 }
  0x7e   :  { %v319_v16 = vsel %vm32_vm3, 1.0, %v379_v13 }
  0x7f   :  { %322 = vmatmul.msk.f32.gmra.mxu0 %vm44_vm1, %v319_v16 }
  0xf4   :  { %v72_v21 = vpop.f32.mrf.mxu0 }
  0xf5   :  { %79 = vst.msk [vmem:[#allocation2] sm:$0xff] %vm78_vm4, %v72_v21 }
  0xfc   :  { %v75_v22 = vpop.f32.mrf.mxu0  ;;  %v85_v23 = vld [vmem:[#allocation2] sm:$0x3]  ;;  %v87_v25 = vld [vmem:[#allocation2 + $0x2] sm:$0x3]  ;;  %v113_v29 = vld [vmem:[#allocation2 + $0x4] sm:$0x3] }
  0xfd   :  { %80 = vst.msk [vmem:[#allocation2 + $0x8] sm:$0xff] %vm78_vm4, %v75_v22  ;;  %336 = vtanh.f32 %v85_v23  ;;  %v139_v33 = vld [vmem:[#allocation2 + $0x6] sm:$0x3] }
 0x103   :  { %v337_v24 = vpop.eup %336 }
 0x104   :  { %323 = vmatmul.msk.f32.vlgmr.msra.gmra.mxu1 %vm78_vm4, %v337_v24  ;;  %v165_v37 = vld [vmem:[#allocation2 + $0x8] sm:$0x3]  ;;  %v191_v41 = vld [vmem:[#allocation2 + $0xa] sm:$0x3]  ;;  %v217_v45 = vld [vmem:[#allocation2 + $0xc] sm:$0x3] }
 0x105   :  { %259 = vmatpush.msra.mxu1 %v84_v17  ;;  %v243_v53 = vld [vmem:[#allocation2 + $0xe] sm:$0x3] }
 0x107   :  { %260 = vmatpush.msra.mxu1 %v83_v18 }
 0x109   :  { %261 = vmatpush.msra.mxu1 %v82_v19 }
 0x10b   :  { %262 = vmatpush.msra.mxu1 %v81_v20 }
 0x181   :  { %v108_v26 = vpop.f32.mrf.mxu1 }
 0x182   :  { %v111_v27 = vadd.f32 %v108_v26, %v87_v25 }
 0x184   :  { %338 = vtanh.f32 %v111_v27 }
 0x18a   :  { %v339_v28 = vpop.eup %338 }
 0x18b   :  { %324 = vmatmul.msk.f32.vlgmr.msra.gmra.mxu2 %vm78_vm4, %v339_v28 }
 0x18c   :  { %292 = vmatpush.msra.mxu2 %v272_v49 }
 0x18e   :  { %293 = vmatpush.msra.mxu2 %v271_v50 }
 0x190   :  { %294 = vmatpush.msra.mxu2 %v270_v51 }
 0x192   :  { %295 = vmatpush.msra.mxu2 %v269_v52 }
 0x20e   :  { %v134_v30 = vpop.f32.mrf.mxu2 }
 0x20f   :  { %v137_v31 = vadd.f32 %v134_v30, %v113_v29 }
 0x211   :  { %340 = vtanh.f32 %v137_v31 }
 0x217   :  { %v341_v32 = vpop.eup %340 }
 0x218   :  { %325 = vmatmul.msk.f32.vlgmr.msra.gmra.mxu3 %vm78_vm4, %v341_v32 }
 0x29b   :  { %v160_v34 = vpop.f32.mrf.mxu3 }
 0x29c   :  { %v163_v35 = vadd.f32 %v160_v34, %v139_v33 }
 0x29e   :  { %342 = vtanh.f32 %v163_v35 }
 0x2a4   :  { %v343_v36 = vpop.eup %342 }
 0x2a5   :  { %326 = vmatmul.msk.f32.vlgmr.msrb.gmra.mxu1 %vm78_vm4, %v343_v36 }
 0x322   :  { %v186_v38 = vpop.f32.mrf.mxu1 }
 0x323   :  { %v189_v39 = vadd.f32 %v186_v38, %v165_v37 }
 0x325   :  { %344 = vtanh.f32 %v189_v39 }
 0x32b   :  { %v345_v40 = vpop.eup %344 }
 0x32c   :  { %327 = vmatmul.msk.f32.vlgmr.msrb.gmra.mxu2 %vm78_vm4, %v345_v40 }
 0x3af   :  { %v212_v42 = vpop.f32.mrf.mxu2 }
 0x3b0   :  { %v215_v43 = vadd.f32 %v212_v42, %v191_v41 }
 0x3b2   :  { %346 = vtanh.f32 %v215_v43 }
 0x3b8   :  { %v347_v44 = vpop.eup %346 }
 0x3b9   :  { %328 = vmatmul.msk.f32.vlgmr.msrb.gmra.mxu3 %vm78_vm4, %v347_v44 }
 0x43c   :  { %v238_v46 = vpop.f32.mrf.mxu3 }
 0x43d   :  { %v241_v47 = vadd.f32 %v238_v46, %v217_v45 }
 0x43f   :  { %348 = vtanh.f32 %v241_v47 }
 0x445   :  { %v349_v48 = vpop.eup %348 }
 0x446   :  { %329 = vmatmul.msk.f32.vlgmr.msra.gmra.mxu1 %vm78_vm4, %v349_v48 }
 0x4c3   :  { %v264_v54 = vpop.f32.mrf.mxu1 }
 0x4c4   :  { %v267_v55 = vadd.f32 %v264_v54, %v243_v53 }
 0x4c6   :  { %350 = vtanh.f32 %v267_v55 }
 0x4cc   :  { %v351_v56 = vpop.eup %350 }
 0x4cd   :  { %330 = vmatmul.msk.f32.vlgmr.msra.gmra.mxu2 %vm78_vm4, %v351_v56 }
 0x550   :  { %v297_v58 = vpop.f32.mrf.mxu2 }
 0x551   :  { %v298_v59 = vadd.f32 %v335_v57, %v297_v58 }
 0x553   :  { %301 = vst.msk [vmem:[#allocation3] sm:$0x3] %vm300_vm5, %v298_v59 }
 0x554   :  { %312 = dma.vmem_to_hbm [thread:$0]  %s308_s27, 32, %s310_s30, [#allocation4]  }
 0x555   :  { %376 = dma.done.wait [#allocation4], 32  }
 0x556   :  { %377 = vsyncadd [#allocation4], 4294967264 }
 0x557   :  { %317 = vsyncpa [#allocation4], 1 }

</bundles_post_ra>
